<compile_context>
chip_gen: v6e
topology: v6e:2x2x1
jax: 0.10.0
libtpu: 0.0.40
codegen_flags: <defaults>
</compile_context>

<pallas_src>
import functools

import jax
import jax.numpy as jnp
from jax import lax
from jax.experimental import pallas as pl
from jax.experimental.pallas import tpu as pltpu

NUM_CLASSES = 21
PADDED_CLASSES = 128  # lane-dense class dimension (one vreg lane width)


def _round_up(a, m):
    return ((a + m - 1) // m) * m


def _vmem_capacity_bytes():
    try:
        return int(pltpu.get_tpu_info().vmem_capacity_bytes)
    except Exception:
        return 64 << 20  # conservative fallback: v7x per-core physical VMEM


def _derive_tiles(B, D, x_sz, w_sz, o_sz, block_m, block_k, vmem_budget):
    """Pick (bm, tk). tk == D (single K block) or a multiple of 128 dividing D."""
    lanes = PADDED_CLASSES
    bm_cap = 1024 if block_m is None else block_m
    bm_cap = max(8, _round_up(min(bm_cap, _round_up(B, 8)), 8))

    if block_k is not None:
        tk_candidates = [block_k]
    else:
        tk_candidates = [D]
        if D % 128 == 0:
            tk_candidates += [t for t in (4096, 2048, 1024, 512, 256, 128)
                              if t < D and D % t == 0]

    best = None
    for tk in tk_candidates:
        fixed = 2 * tk * lanes * w_sz                            # weight buffers (worst case x2)
        per_row = 2 * tk * x_sz + 2 * lanes * o_sz + lanes * 4   # x (x2), out (x2), f32 acc
        avail = vmem_budget - fixed
        if avail < per_row * 8:
            continue
        bm = min(bm_cap, (avail // per_row) // 8 * 8)
        if best is None or bm > best[0]:
            best = (bm, tk)
        if bm >= min(bm_cap, 512):
            break  # big enough row tile; prefer the largest tk (fewest K steps)
    if best is None:
        # TODO(synk): for D so large that even tk=128 weight buffers blow VMEM,
        # keep W in HBM (memory_space=pl.ANY) and stream it manually.
        best = (8, tk_candidates[-1])
    return best


def _predictor_svd_kernel(x_ref, w_ref, o_ref, acc_ref, *, num_classes, inv_t):
    k = pl.program_id(1)

    @pl.when(k == 0)
    def _():
        acc_ref[...] = jnp.zeros_like(acc_ref)

    # Partial logits for this K chunk: (bm, tk) @ (tk, 128) on the MXU, f32 accumulate.
    acc_ref[...] += jnp.dot(x_ref[...], w_ref[...],
                            preferred_element_type=jnp.float32)

    @pl.when(k == pl.num_programs(1) - 1)
    def _():
        # 1/T applied here in f32 (kept out of the possibly low-precision weights).
        logits = acc_ref[...] * inv_t
        # Mask the padded class lanes (load-bearing: zero-padded W columns would
        # otherwise contribute exp(0) to the denominator).
        lane = lax.broadcasted_iota(jnp.int32, (1, logits.shape[-1]), 1)
        logits = jnp.where(lane < num_classes, logits, -jnp.inf)
        m = jnp.max(logits, axis=-1, keepdims=True)      # XLU
        e = jnp.exp(logits - m)                          # EUP
        denom = jnp.sum(e, axis=-1, keepdims=True)       # XLU
        inv = pl.reciprocal(denom, approx=True)          # EUP (free slot)
        o_ref[...] = (e * inv).astype(o_ref.dtype)


def predictor_svd_forward(x, U, s, vh, scale, *, T=0.01, block_m=None, block_k=None,
                          weight_dtype=None, out_dtype=jnp.float32):
    """x: (B, D); U: (21, 21); s: (>=21,); vh: (>=21, D) (== torch V.t()); scale: (21,)."""
    B, D = x.shape

    # ---- grid-invariant parameter glue (tiny (21,21)@(21,D), done once, plain JAX) ----
    svt = (s[:NUM_CLASSES] * scale)[:, None] * vh[:NUM_CLASSES, :]
    classifier = U.astype(jnp.float32) @ svt.astype(jnp.float32)            # (21, D)
    w_dt = x.dtype if weight_dtype is None else jnp.dtype(weight_dtype)
    # W = classifier^T zero-padded to 128 lane-dense classes; 1/T NOT folded in.
    w = jnp.pad(classifier.T, ((0, 0), (0, PADDED_CLASSES - NUM_CLASSES))).astype(w_dt)

    x_sz = jnp.dtype(x.dtype).itemsize
    w_sz = jnp.dtype(w_dt).itemsize
    o_sz = jnp.dtype(out_dtype).itemsize

    if block_k is not None and block_k != D:
        if block_k % 128 != 0 or D % block_k != 0:
            raise ValueError("block_k must equal D or be a multiple of 128 dividing D")

    vmem_cap = _vmem_capacity_bytes()
    bm, tk = _derive_tiles(B, D, x_sz, w_sz, o_sz, block_m, block_k,
                           vmem_budget=(vmem_cap * 3) // 4)
    nb = pl.cdiv(B, bm)   # ragged last row-block: softmax is row-local, OOB rows masked on store
    nk = D // tk

    needed = (2 * bm * tk * x_sz + 2 * tk * PADDED_CLASSES * w_sz
              + 2 * bm * PADDED_CLASSES * o_sz + bm * PADDED_CLASSES * 4)
    vmem_limit = int(min(vmem_cap, max(needed + (4 << 20), 32 << 20)))

    kernel = functools.partial(_predictor_svd_kernel,
                               num_classes=NUM_CLASSES, inv_t=float(1.0 / T))

    cost = pl.CostEstimate(
        flops=2 * B * D * PADDED_CLASSES,
        transcendentals=B * PADDED_CLASSES,
        bytes_accessed=(B * D * x_sz + D * PADDED_CLASSES * w_sz
                        + B * PADDED_CLASSES * o_sz))

    def build(single_buffer_w):
        w_kwargs = {"pipeline_mode": pl.Buffered(1)} if single_buffer_w else {}
        return pl.pallas_call(
            kernel,
            out_shape=jax.ShapeDtypeStruct((B, PADDED_CLASSES), out_dtype),
            grid_spec=pltpu.PrefetchScalarGridSpec(
                num_scalar_prefetch=0,
                grid=(nb, nk),
                in_specs=[
                    pl.BlockSpec((bm, tk), lambda i, k: (i, k)),              # x tile
                    pl.BlockSpec((tk, PADDED_CLASSES), lambda i, k: (k, 0),   # weight
                                 **w_kwargs),
                ],
                out_specs=pl.BlockSpec((bm, PADDED_CLASSES), lambda i, k: (i, 0)),
                scratch_shapes=[pltpu.VMEM((bm, PADDED_CLASSES), jnp.float32)],
            ),
            compiler_params=pltpu.CompilerParams(
                dimension_semantics=("parallel", "arbitrary"),
                vmem_limit_bytes=vmem_limit),
            cost_estimate=cost,
        )

    want_single = (nk == 1)  # weight index_map is constant -> second buffer is pure waste
    if want_single:
        try:
            out = jax.block_until_ready(build(True)(x, w))
        except Exception:
            out = build(False)(x, w)   # pipeline_mode unsupported -> default double-buffering
    else:
        out = build(False)(x, w)

    return out[:, :NUM_CLASSES]


def _set_svd(centers, sharp_factor=1.0, base_value=1.0):
    """Replicates predictor_svd.set_SVD.  torch V.t()[:21,:] == jnp vh[:21,:]."""
    U, S, vh = jnp.linalg.svd(centers, full_matrices=True)
    s = base_value * jnp.abs(S / base_value) ** sharp_factor
    s = jnp.sign(S) * s
    return U.astype(jnp.float32), s.astype(jnp.float32), vh.astype(jnp.float32)


def _reference_forward(x, U, s, vh, scale, T=0.01):
    classifier = U @ ((s[:NUM_CLASSES] * scale)[:, None] * vh[:NUM_CLASSES, :])
    logits = jnp.dot(x, classifier.T, precision=lax.Precision.HIGHEST) / T
    return jax.nn.softmax(logits, axis=-1)


if __name__ == "__main__":
    key = jax.random.PRNGKey(0)
    k_x1, k_c1, k_x2, k_c2 = jax.random.split(key, 4)

    scale = jnp.ones((NUM_CLASSES,), dtype=jnp.float32)

    # Case 1: small feature dim -> single K block (nk == 1), single-buffered weight.
    B1, D1 = 64, 32
    x1 = 0.005 * jax.random.normal(k_x1, (B1, D1), dtype=jnp.float32)
    centers1 = jax.random.normal(k_c1, (NUM_CLASSES, D1), dtype=jnp.float32)
    U1, s1, vh1 = _set_svd(centers1)
    out1 = jax.block_until_ready(predictor_svd_forward(x1, U1, s1, vh1, scale, T=0.01))
    ref1 = _reference_forward(x1, U1, s1, vh1, scale, T=0.01)
    assert out1.shape == (B1, NUM_CLASSES)
    assert jnp.allclose(out1, ref1, rtol=1e-2, atol=1e-3), "case 1 mismatch vs reference"

    # Case 2: ragged batch (50 % 32 != 0) + K-tiled accumulation path (D=256, tk=128).
    B2, D2 = 50, 256
    x2 = 0.002 * jax.random.normal(k_x2, (B2, D2), dtype=jnp.float32)
    centers2 = jax.random.normal(k_c2, (NUM_CLASSES, D2), dtype=jnp.float32)
    U2, s2, vh2 = _set_svd(centers2)
    out2 = jax.block_until_ready(
        predictor_svd_forward(x2, U2, s2, vh2, scale, T=0.01, block_m=32, block_k=128))
    ref2 = _reference_forward(x2, U2, s2, vh2, scale, T=0.01)
    assert out2.shape == (B2, NUM_CLASSES)
    assert jnp.allclose(out2, ref2, rtol=1e-2, atol=1e-3), "case 2 mismatch vs reference"

    print("KERNEL_OK")
</pallas_src>

<mosaic_0001>
module attributes {stable_mosaic.version = 11 : i64} {
  func.func @_predictor_svd_kernel(%arg0: i32, %arg1: i32, %arg2: memref<64x32xf32, #tpu.memory_space<vmem>>, %arg3: memref<32x128xf32, #tpu.memory_space<vmem>>, %arg4: memref<64x128xf32, #tpu.memory_space<vmem>>, %arg5: memref<64x128xf32, #tpu.memory_space<vmem>>) attributes {dimension_semantics = [#tpu.dimension_semantics<parallel>, #tpu.dimension_semantics<arbitrary>], iteration_bounds = array<i64: 1, 1>, scalar_prefetch = 0 : i64, scratch_operands = 1 : i64, tpu.core_type = #tpu.core_type<tc>, window_params = [{transform_indices = @transform_0, window_bounds = array<i64: 64, 32>}, {pipeline_mode = #tpu.pipeline_mode<synchronous>, transform_indices = @transform_1, window_bounds = array<i64: 32, 128>}, {transform_indices = @transform_2, window_bounds = array<i64: 64, 128>}]} {
    %c0_i32 = arith.constant 0 : i32
    %0 = arith.cmpi eq, %arg1, %c0_i32 : i32
    %1 = arith.extui %0 : i1 to i32
    %c0_i32_0 = arith.constant 0 : i32
    %2 = arith.cmpi ne, %1, %c0_i32_0 : i32
    scf.if %2 {
      %cst_10 = arith.constant 0.000000e+00 : f32
      %12 = vector.broadcast %cst_10 : f32 to vector<64x128xf32>
      %c0_11 = arith.constant 0 : index
      %c0_12 = arith.constant 0 : index
      %13 = vector.load %arg5[%c0_11, %c0_12] : memref<64x128xf32, #tpu.memory_space<vmem>>, vector<64x128xf32>
      tpu.vector_store %arg5[%c0_11, %c0_12], %12 {strides = array<i32>} : memref<64x128xf32, #tpu.memory_space<vmem>>, vector<64x128xf32>,
    } else {
    }
    %c0 = arith.constant 0 : index
    %c0_1 = arith.constant 0 : index
    %3 = vector.load %arg5[%c0, %c0_1] : memref<64x128xf32, #tpu.memory_space<vmem>>, vector<64x128xf32>
    %c0_2 = arith.constant 0 : index
    %c0_3 = arith.constant 0 : index
    %4 = vector.load %arg2[%c0_2, %c0_3] : memref<64x32xf32, #tpu.memory_space<vmem>>, vector<64x32xf32>
    %c0_4 = arith.constant 0 : index
    %c0_5 = arith.constant 0 : index
    %5 = vector.load %arg3[%c0_4, %c0_5] : memref<32x128xf32, #tpu.memory_space<vmem>>, vector<32x128xf32>
    %cst = arith.constant dense<0.000000e+00> : vector<64x128xf32>
    %6 = tpu.matmul %4, %5, %cst {dimension_numbers = #tpu.dot_dimension_numbers<[1], [0], [0], [1], [0, 0, 1, 1], [], []>} : vector<64x32xf32>, vector<32x128xf32>, vector<64x128xf32> -> vector<64x128xf32>
    %7 = arith.addf %3, %6 : vector<64x128xf32>
    %c0_6 = arith.constant 0 : index
    %c0_7 = arith.constant 0 : index
    %8 = vector.load %arg5[%c0_6, %c0_7] : memref<64x128xf32, #tpu.memory_space<vmem>>, vector<64x128xf32>
    tpu.vector_store %arg5[%c0_6, %c0_7], %7 {strides = array<i32>} : memref<64x128xf32, #tpu.memory_space<vmem>>, vector<64x128xf32>,
    %c0_i32_8 = arith.constant 0 : i32
    %9 = arith.cmpi eq, %arg1, %c0_i32_8 : i32
    %10 = arith.extui %9 : i1 to i32
    %c0_i32_9 = arith.constant 0 : i32
    %11 = arith.cmpi ne, %10, %c0_i32_9 : i32
    scf.if %11 {
      %c0_10 = arith.constant 0 : index
      %c0_11 = arith.constant 0 : index
      %12 = vector.load %arg5[%c0_10, %c0_11] : memref<64x128xf32, #tpu.memory_space<vmem>>, vector<64x128xf32>
      %cst_12 = arith.constant 1.000000e+02 : f32
      %13 = vector.broadcast %cst_12 : f32 to vector<64x128xf32>
      %14 = arith.mulf %12, %13 : vector<64x128xf32>
      %15 = tpu.iota {dimensions = array<i32: 1>} : vector<1x128xi32>
      %c21_i32 = arith.constant 21 : i32
      %16 = vector.broadcast %c21_i32 : i32 to vector<1x128xi32>
      %17 = arith.cmpi slt, %15, %16 : vector<1x128xi32>
      %cst_13 = arith.constant 0xFF800000 : f32
      %18 = vector.shape_cast %17 : vector<1x128xi1> to vector<1x128xi1>
      %19 = vector.broadcast %18 : vector<1x128xi1> to vector<64x128xi1>
      %20 = vector.broadcast %cst_13 : f32 to vector<64x128xf32>
      %21 = arith.select %19, %14, %20 : vector<64x128xi1>, vector<64x128xf32>
      %cst_14 = arith.constant dense<0xFF800000> : vector<64xf32>
      %22 = vector.multi_reduction <maximumf>, %21, %cst_14 [1] : vector<64x128xf32> to vector<64xf32>
      %23 = vector.shape_cast %22 : vector<64xf32> to vector<64x1xf32>
      %24 = vector.broadcast %23 : vector<64x1xf32> to vector<64x128xf32>
      %25 = arith.subf %21, %24 : vector<64x128xf32>
      %26 = math.exp %25 : vector<64x128xf32>
      %cst_15 = arith.constant dense<0.000000e+00> : vector<64xf32>
      %27 = vector.multi_reduction <add>, %26, %cst_15 [1] : vector<64x128xf32> to vector<64xf32>
      %28 = vector.shape_cast %27 : vector<64xf32> to vector<64x1xf32>
      %29 = tpu.reciprocal %28 {approx = true} : vector<64x1xf32> -> vector<64x1xf32>
      %30 = vector.broadcast %29 : vector<64x1xf32> to vector<64x128xf32>
      %31 = arith.mulf %26, %30 : vector<64x128xf32>
      %c0_16 = arith.constant 0 : index
      %c0_17 = arith.constant 0 : index
      %32 = vector.load %arg4[%c0_16, %c0_17] : memref<64x128xf32, #tpu.memory_space<vmem>>, vector<64x128xf32>
      tpu.vector_store %arg4[%c0_16, %c0_17], %31 {strides = array<i32>} : memref<64x128xf32, #tpu.memory_space<vmem>>, vector<64x128xf32>,
    } else {
    }
    return
  }
  func.func @transform_0(%arg0: i32, %arg1: i32) -> (i32, i32) {
    %c0_i32 = arith.constant 0 : i32
    return %arg0, %arg1 : i32, i32
  }
  func.func @transform_1(%arg0: i32, %arg1: i32) -> (i32, i32) {
    %c0_i32 = arith.constant 0 : i32
    %c0_i32_0 = arith.constant 0 : i32
    return %arg1, %c0_i32 : i32, i32
  }
  func.func @transform_2(%arg0: i32, %arg1: i32) -> (i32, i32) {
    %c0_i32 = arith.constant 0 : i32
    %c0_i32_0 = arith.constant 0 : i32
    return %arg0, %c0_i32 : i32, i32
  }
}

module attributes {stable_mosaic.version = 11 : i64} {
  func.func @_predictor_svd_kernel(%arg0: i32, %arg1: i32, %arg2: memref<64x32xf32, #tpu.memory_space<vmem>>, %arg3: memref<32x128xf32, #tpu.memory_space<vmem>>, %arg4: memref<64x128xf32, #tpu.memory_space<vmem>>, %arg5: memref<64x128xf32, #tpu.memory_space<vmem>>) attributes {dimension_semantics = [#tpu.dimension_semantics<parallel>, #tpu.dimension_semantics<arbitrary>], iteration_bounds = array<i64: 1, 1>, scalar_prefetch = 0 : i64, scratch_operands = 1 : i64, tpu.core_type = #tpu.core_type<tc>, window_params = [{transform_indices = @transform_0, window_bounds = array<i64: 64, 32>}, {transform_indices = @transform_1, window_bounds = array<i64: 32, 128>}, {transform_indices = @transform_2, window_bounds = array<i64: 64, 128>}]} {
    %c0_i32 = arith.constant 0 : i32
    %0 = arith.cmpi eq, %arg1, %c0_i32 : i32
    %1 = arith.extui %0 : i1 to i32
    %c0_i32_0 = arith.constant 0 : i32
    %2 = arith.cmpi ne, %1, %c0_i32_0 : i32
    scf.if %2 {
      %cst_10 = arith.constant 0.000000e+00 : f32
      %12 = vector.broadcast %cst_10 : f32 to vector<64x128xf32>
      %c0_11 = arith.constant 0 : index
      %c0_12 = arith.constant 0 : index
      %13 = vector.load %arg5[%c0_11, %c0_12] : memref<64x128xf32, #tpu.memory_space<vmem>>, vector<64x128xf32>
      tpu.vector_store %arg5[%c0_11, %c0_12], %12 {strides = array<i32>} : memref<64x128xf32, #tpu.memory_space<vmem>>, vector<64x128xf32>,
    } else {
    }
    %c0 = arith.constant 0 : index
    %c0_1 = arith.constant 0 : index
    %3 = vector.load %arg5[%c0, %c0_1] : memref<64x128xf32, #tpu.memory_space<vmem>>, vector<64x128xf32>
    %c0_2 = arith.constant 0 : index
    %c0_3 = arith.constant 0 : index
    %4 = vector.load %arg2[%c0_2, %c0_3] : memref<64x32xf32, #tpu.memory_space<vmem>>, vector<64x32xf32>
    %c0_4 = arith.constant 0 : index
    %c0_5 = arith.constant 0 : index
    %5 = vector.load %arg3[%c0_4, %c0_5] : memref<32x128xf32, #tpu.memory_space<vmem>>, vector<32x128xf32>
    %cst = arith.constant dense<0.000000e+00> : vector<64x128xf32>
    %6 = tpu.matmul %4, %5, %cst {dimension_numbers = #tpu.dot_dimension_numbers<[1], [0], [0], [1], [0, 0, 1, 1], [], []>} : vector<64x32xf32>, vector<32x128xf32>, vector<64x128xf32> -> vector<64x128xf32>
    %7 = arith.addf %3, %6 : vector<64x128xf32>
    %c0_6 = arith.constant 0 : index
    %c0_7 = arith.constant 0 : index
    %8 = vector.load %arg5[%c0_6, %c0_7] : memref<64x128xf32, #tpu.memory_space<vmem>>, vector<64x128xf32>
    tpu.vector_store %arg5[%c0_6, %c0_7], %7 {strides = array<i32>} : memref<64x128xf32, #tpu.memory_space<vmem>>, vector<64x128xf32>,
    %c0_i32_8 = arith.constant 0 : i32
    %9 = arith.cmpi eq, %arg1, %c0_i32_8 : i32
    %10 = arith.extui %9 : i1 to i32
    %c0_i32_9 = arith.constant 0 : i32
    %11 = arith.cmpi ne, %10, %c0_i32_9 : i32
    scf.if %11 {
      %c0_10 = arith.constant 0 : index
      %c0_11 = arith.constant 0 : index
      %12 = vector.load %arg5[%c0_10, %c0_11] : memref<64x128xf32, #tpu.memory_space<vmem>>, vector<64x128xf32>
      %cst_12 = arith.constant 1.000000e+02 : f32
      %13 = vector.broadcast %cst_12 : f32 to vector<64x128xf32>
      %14 = arith.mulf %12, %13 : vector<64x128xf32>
      %15 = tpu.iota {dimensions = array<i32: 1>} : vector<1x128xi32>
      %c21_i32 = arith.constant 21 : i32
      %16 = vector.broadcast %c21_i32 : i32 to vector<1x128xi32>
      %17 = arith.cmpi slt, %15, %16 : vector<1x128xi32>
      %cst_13 = arith.constant 0xFF800000 : f32
      %18 = vector.shape_cast %17 : vector<1x128xi1> to vector<1x128xi1>
      %19 = vector.broadcast %18 : vector<1x128xi1> to vector<64x128xi1>
      %20 = vector.broadcast %cst_13 : f32 to vector<64x128xf32>
      %21 = arith.select %19, %14, %20 : vector<64x128xi1>, vector<64x128xf32>
      %cst_14 = arith.constant dense<0xFF800000> : vector<64xf32>
      %22 = vector.multi_reduction <maximumf>, %21, %cst_14 [1] : vector<64x128xf32> to vector<64xf32>
      %23 = vector.shape_cast %22 : vector<64xf32> to vector<64x1xf32>
      %24 = vector.broadcast %23 : vector<64x1xf32> to vector<64x128xf32>
      %25 = arith.subf %21, %24 : vector<64x128xf32>
      %26 = math.exp %25 : vector<64x128xf32>
      %cst_15 = arith.constant dense<0.000000e+00> : vector<64xf32>
      %27 = vector.multi_reduction <add>, %26, %cst_15 [1] : vector<64x128xf32> to vector<64xf32>
      %28 = vector.shape_cast %27 : vector<64xf32> to vector<64x1xf32>
      %29 = tpu.reciprocal %28 {approx = true} : vector<64x1xf32> -> vector<64x1xf32>
      %30 = vector.broadcast %29 : vector<64x1xf32> to vector<64x128xf32>
      %31 = arith.mulf %26, %30 : vector<64x128xf32>
      %c0_16 = arith.constant 0 : index
      %c0_17 = arith.constant 0 : index
      %32 = vector.load %arg4[%c0_16, %c0_17] : memref<64x128xf32, #tpu.memory_space<vmem>>, vector<64x128xf32>
      tpu.vector_store %arg4[%c0_16, %c0_17], %31 {strides = array<i32>} : memref<64x128xf32, #tpu.memory_space<vmem>>, vector<64x128xf32>,
    } else {
    }
    return
  }
  func.func @transform_0(%arg0: i32, %arg1: i32) -> (i32, i32) {
    %c0_i32 = arith.constant 0 : i32
    return %arg0, %arg1 : i32, i32
  }
  func.func @transform_1(%arg0: i32, %arg1: i32) -> (i32, i32) {
    %c0_i32 = arith.constant 0 : i32
    %c0_i32_0 = arith.constant 0 : i32
    return %arg1, %c0_i32 : i32, i32
  }
  func.func @transform_2(%arg0: i32, %arg1: i32) -> (i32, i32) {
    %c0_i32 = arith.constant 0 : i32
    %c0_i32_0 = arith.constant 0 : i32
    return %arg0, %c0_i32 : i32, i32
  }
}

</mosaic_0001>

<bundles_post_ra>
// kernel: tpu_custom_call.1
= control target key start
LH: loop header
LB: loop body
LE: loop exit
PB: predicated region body
PF: predicated region fallthrough
CT: control target
= control target key end

     0   :  { %s496_s0 = inlined_call_operand.vmem [shape: f32[64,32], index: 0, kind: input, shape index: {}]   ;;  %s497_s1 = inlined_call_operand.vmem [shape: f32[32,128], index: 1, kind: input, shape index: {}]   ;;  %s498_s2 = inlined_call_operand.hbm [shape: f32[64,128], index: 2, kind: output, shape index: {}]  }
   0x1   :  { %v43_v0 = vld [vmem:[%s497_s1 + $0x18] sm:$0xff]  ;;  %v42_v1 = vld [vmem:[%s497_s1 + $0x10] sm:$0xff]  ;;  %v41_v2 = vld [vmem:[%s497_s1 + $0x8] sm:$0xff] }
   0x2   :  { %338 = vmatprep.subr.mxu0 %v43_v0  ;;  %358 = vmatprep.subr.mxu1 %v43_v0  ;;  %v40_v3 = vld [vmem:[%s497_s1] sm:$0xff] }
   0x3   :  { %339 = vmatpush3.msra.mxu0 %v43_v0  ;;  %362 = vmatpush3.msra.mxu1 %v43_v0 }
   0x4   :  { %340 = vmatprep.subr.mxu0 %v42_v1  ;;  %359 = vmatprep.subr.mxu1 %v42_v1 }
   0x5   :  { %341 = vmatpush3.msra.mxu0 %v42_v1  ;;  %363 = vmatpush3.msra.mxu1 %v42_v1 }
   0x6   :  { %7 = vsyncpa [#allocation4], 0  ;;  %342 = vmatprep.subr.mxu0 %v41_v2  ;;  %360 = vmatprep.subr.mxu1 %v41_v2  ;;  %v32_v4 = vld [vmem:[%s496_s0] sm:$0xff]  ;;  %vm44_vm0 = vcmask 261120   ;;  %v33_v6 = vld [vmem:[%s496_s0 + $0x8] sm:$0xff]  ;;  %v209_v12 = vlaneseq }
   0x7   :  { %343 = vmatpush3.msra.mxu0 %v41_v2  ;;  %364 = vmatpush3.msra.mxu1 %v41_v2  ;;  %v36_v5 = vld [vmem:[%s496_s0 + $0x20] sm:$0xff]  ;;  %v37_v7 = vld [vmem:[%s496_s0 + $0x28] sm:$0xff]  ;;  %v34_v8 = vld [vmem:[%s496_s0 + $0x10] sm:$0xff] }
   0x8   :  { %344 = vmatprep.subr.mxu0 %v40_v3  ;;  %361 = vmatprep.subr.mxu1 %v40_v3  ;;  %v38_v9 = vld [vmem:[%s496_s0 + $0x30] sm:$0xff]  ;;  %v35_v10 = vld [vmem:[%s496_s0 + $0x18] sm:$0xff]  ;;  %v210_v13 = vand.u32 127, %v209_v12 }
   0x9   :  { %345 = vmatpush3.msra.mxu0 %v40_v3  ;;  %365 = vmatpush3.msra.mxu1 %v40_v3  ;;  %v39_v11 = vld [vmem:[%s496_s0 + $0x38] sm:$0xff]  ;;  %s423_s0 = smov [#allocation3]  }
   0xa   :  { %346 = vmatprep.mubr.msk.f32.mxu0 %vm44_vm0, %v32_v4  ;;  %352 = vmatprep.mubr.msk.f32.mxu1 %vm44_vm0, %v36_v5  ;;  %vm211_vm1 = vcmp.lt.s32.totalorder %v210_v13, 21  ;;  %s307_s4 = sshll.u32 %s423_s0, 4  ;;  %s308_s4 = int_to_ptr.vmem [resolvable:$true] %s307_s4 }
   0xb   :  { %347 = vmatmul.mubr.msk.f32.vlgmr.msra.gmra.mxu0 %vm44_vm0, %v33_v6  ;;  %353 = vmatmul.mubr.msk.f32.vlgmr.msra.gmra.mxu1 %vm44_vm0, %v37_v7  ;;  %s401_s5 = scalar_lea.vmem %s308_s4, 1024  ;;  %p406_p1 = scmp.lt.s32.totalorder %s308_s4, %s308_s4 }
   0xc   :  { %349 = vmatprep.mubr.msk.f32.mxu0 %vm44_vm0, %v34_v8  ;;  %355 = vmatprep.mubr.msk.f32.mxu1 %vm44_vm0, %v38_v9  ;;  %p402_p0 = scmp.ne.s32.totalorder %s308_s4, %s401_s5  ;;  %p407_p2 = scmp.lt.s32.totalorder %s401_s5, %s401_s5 }
   0xe   :  { %p408_p3 = por %p407_p2, %p406_p1 }
   0xf   :  { %350 = vmatmul.mubr.msk.f32.gmra.mxu0 %vm44_vm0, %v35_v10  ;;  %356 = vmatmul.mubr.msk.f32.gmra.mxu1 %vm44_vm0, %v39_v11 }
  0x10   :  { %p409_p4 = pnand %p408_p3, %p402_p0 }
  0xcb   :  { %v348_v14 = vpop.f32.mrf.mxu0  ;;  %v354_v15 = vpop.f32.mrf.mxu1 }
  0xcc   :  { %v202_v16 = vmul.f32 100.0, %v348_v14  ;;  %v206_v17 = vmul.f32 100.0, %v354_v15 }
  0xcd   :  { %v135_v18 = vpop.f32.mrf.mxu0  ;;  %v155_v19 = vpop.f32.mrf.mxu1 }
  0xce   :  { %v201_v20 = vmul.f32 100.0, %v135_v18  ;;  %v219_v21 = vsel %vm211_vm1, %v206_v17, -inf  ;;  %v215_v22 = vsel %vm211_vm1, %v202_v16, -inf  ;;  %v205_v28 = vmul.f32 100.0, %v155_v19 }
  0xcf   :  { %232 = vmax.xlane.f32.xlu1 %v219_v21  ;;  %224 = vmax.xlane.f32.xlu0 %v215_v22  ;;  %v351_v23 = vpop.f32.mrf.mxu0  ;;  %v357_v24 = vpop.f32.mrf.mxu1 }
  0xd0   :  { %v204_v25 = vmul.f32 100.0, %v351_v23  ;;  %v214_v29 = vsel %vm211_vm1, %v201_v20, -inf  ;;  %v208_v32 = vmul.f32 100.0, %v357_v24  ;;  %v218_v35 = vsel %vm211_vm1, %v205_v28, -inf }
  0xd1   :  { %v145_v26 = vpop.f32.mrf.mxu0  ;;  %v165_v27 = vpop.f32.mrf.mxu1 }
  0xd2   :  { %v217_v30 = vsel %vm211_vm1, %v204_v25, -inf  ;;  %v203_v31 = vmul.f32 100.0, %v145_v26  ;;  %v207_v33 = vmul.f32 100.0, %v165_v27  ;;  %v221_v37 = vsel %vm211_vm1, %v208_v32, -inf }
  0xd3   :  { %222 = vmax.xlane.f32.xlu0 %v214_v29  ;;  %228 = vmax.xlane.f32.xlu1 %v217_v30 }
  0xd4   :  { %v216_v34 = vsel %vm211_vm1, %v203_v31, -inf  ;;  %v220_v36 = vsel %vm211_vm1, %v207_v33, -inf }
  0xd7   :  { %230 = vmax.xlane.f32.xlu0 %v218_v35  ;;  %226 = vmax.xlane.f32.xlu1 %v216_v34 }
  0xdb   :  { %234 = vmax.xlane.f32.xlu0 %v220_v36  ;;  %236 = vmax.xlane.f32.xlu1 %v221_v37 }
 0x158   :  { %v233_v38 = vpop.xlane.xlu1 %232  ;;  %v225_v39 = vpop.xlane.xlu0 %224 }
 0x159   :  { %v239_v40 = vsub.f32 %v215_v22, %v225_v39  ;;  %v243_v41 = vsub.f32 %v219_v21, %v233_v38 }
 0x15b   :  { %v248_v42 = vmul.f32 1.442695, %v239_v40  ;;  %v256_v46 = vmul.f32 1.442695, %v243_v41 }
 0x15c   :  { %v223_v43 = vpop.xlane.xlu0 %222  ;;  %v229_v44 = vpop.xlane.xlu1 %228 }
 0x15d   :  { %v238_v45 = vsub.f32 %v214_v29, %v223_v43  ;;  %369 = vpow2.f32 %v248_v42  ;;  %v241_v47 = vsub.f32 %v217_v30, %v229_v44 }
 0x15f   :  { %v246_v48 = vmul.f32 1.442695, %v238_v45  ;;  %v252_v53 = vmul.f32 1.442695, %v241_v47 }
 0x160   :  { %v231_v49 = vpop.xlane.xlu0 %230  ;;  %v227_v50 = vpop.xlane.xlu1 %226 }
 0x161   :  { %371 = vpow2.f32 %v246_v48  ;;  %v242_v51 = vsub.f32 %v218_v35, %v231_v49  ;;  %v240_v52 = vsub.f32 %v216_v34, %v227_v50 }
 0x162   :  { %373 = vpow2.f32 %v256_v46 }
 0x163   :  { %v254_v54 = vmul.f32 1.442695, %v242_v51  ;;  %v250_v57 = vmul.f32 1.442695, %v240_v52 }
 0x164   :  { %v235_v55 = vpop.xlane.xlu0 %234  ;;  %v237_v56 = vpop.xlane.xlu1 %236 }
 0x165   :  { %375 = vpow2.f32 %v254_v54  ;;  %v244_v58 = vsub.f32 %v220_v36, %v235_v55  ;;  %v245_v59 = vsub.f32 %v221_v37, %v237_v56 }
 0x166   :  { %377 = vpow2.f32 %v252_v53 }
 0x167   :  { %v260_v60 = vmul.f32 1.442695, %v245_v59  ;;  %379 = vpow2.f32 %v250_v57  ;;  %v258_v61 = vmul.f32 1.442695, %v244_v58 }
 0x169   :  { %381 = vpow2.f32 %v260_v60 }
 0x16a   :  { %v370_v62 = vpop.eup %369  ;;  %383 = vpow2.f32 %v258_v61 }
 0x16b   :  { %264 = vadd.xlane.f32.xlu1 %v370_v62 }
 0x16e   :  { %v372_v63 = vpop.eup %371 }
 0x16f   :  { %v374_v0 = vpop.eup %373  ;;  %262 = vadd.xlane.f32.xlu0 %v372_v63 }
 0x170   :  { %272 = vadd.xlane.f32.xlu1 %v374_v0 }
 0x172   :  { %v376_v1 = vpop.eup %375 }
 0x173   :  { %v378_v2 = vpop.eup %377  ;;  %270 = vadd.xlane.f32.xlu0 %v376_v1 }
 0x174   :  { %268 = vadd.xlane.f32.xlu1 %v378_v2  ;;  %v380_v3 = vpop.eup %379 }
 0x176   :  { %v382_v4 = vpop.eup %381 }
 0x177   :  { %266 = vadd.xlane.f32.xlu0 %v380_v3  ;;  %v384_v5 = vpop.eup %383 }
 0x178   :  { %276 = vadd.xlane.f32.xlu1 %v382_v4 }
 0x17b   :  { %274 = vadd.xlane.f32.xlu0 %v384_v5 }
 0x1f4   :  { %v265_v6 = vpop.xlane.xlu1 %264 }
 0x1f5   :  { %385 = vrcp.f32 %v265_v6 }
 0x1f8   :  { %v263_v7 = vpop.xlane.xlu0 %262 }
 0x1f9   :  { %387 = vrcp.f32 %v263_v7  ;;  %v273_v8 = vpop.xlane.xlu1 %272 }
 0x1fa   :  { %389 = vrcp.f32 %v273_v8 }
 0x1fc   :  { %v271_v9 = vpop.xlane.xlu0 %270 }
 0x1fd   :  { %391 = vrcp.f32 %v271_v9  ;;  %v269_v10 = vpop.xlane.xlu1 %268 }
 0x1fe   :  { %393 = vrcp.f32 %v269_v10 }
 0x200   :  { %v267_v11 = vpop.xlane.xlu0 %266 }
 0x201   :  { %395 = vrcp.f32 %v267_v11  ;;  %v277_v12 = vpop.xlane.xlu1 %276 }
 0x202   :  { %397 = vrcp.f32 %v277_v12  ;;  %v386_v13 = vpop.eup %385 }
 0x203   :  { %v287_v14 = vmul.f32 %v386_v13, %v370_v62 }
 0x204   :  { %v275_v15 = vpop.xlane.xlu0 %274 }
 0x205   :  { %399 = vrcp.f32 %v275_v15  ;;  %295 = vst [vmem:[#allocation3 + $0x8] sm:$0xff] %v287_v14 }
 0x206   :  { %v388_v16 = vpop.eup %387 }
 0x207   :  { %v390_v17 = vpop.eup %389  ;;  %v286_v18 = vmul.f32 %v388_v16, %v372_v63 }
 0x208   :  { %v291_v19 = vmul.f32 %v390_v17, %v374_v0 }
 0x209   :  { %294 = vst [vmem:[#allocation3] sm:$0xff] %v286_v18 }
 0x20a   :  { %v392_v20 = vpop.eup %391  ;;  %299 = vst [vmem:[#allocation3 + $0x28] sm:$0xff] %v291_v19 }
 0x20b   :  { %v394_v21 = vpop.eup %393  ;;  %v290_v22 = vmul.f32 %v392_v20, %v376_v1 }
 0x20c   :  { %v289_v23 = vmul.f32 %v394_v21, %v378_v2 }
 0x20d   :  { %298 = vst [vmem:[#allocation3 + $0x20] sm:$0xff] %v290_v22 }
 0x20e   :  { %v396_v24 = vpop.eup %395  ;;  %297 = vst [vmem:[#allocation3 + $0x18] sm:$0xff] %v289_v23 }
 0x20f   :  { %v398_v25 = vpop.eup %397  ;;  %v288_v26 = vmul.f32 %v396_v24, %v380_v3 }
 0x210   :  { %v293_v27 = vmul.f32 %v398_v25, %v382_v4 }
 0x211   :  { %296 = vst [vmem:[#allocation3 + $0x10] sm:$0xff] %v288_v26 }
 0x212   :  { %v400_v28 = vpop.eup %399  ;;  %301 = vst [vmem:[#allocation3 + $0x38] sm:$0xff] %v293_v27 }
 0x213   :  { %v292_v29 = vmul.f32 %v400_v28, %v384_v5 }
 0x215   :  { %300 = vst [vmem:[#allocation3 + $0x30] sm:$0xff] %v292_v29 }
 0x216   :  { %412 = shalt.err (!%p409_p4)
}
 0x217   :  { %s424_s6 = smov 128   ;;  %s425_s7 = smov 8  }
 0x218   :  { %313 = dma.vmem_to_hbm [thread:$0]  %s308_s4, 1024, %s498_s2, [#allocation4], %s424_s6, %s424_s6, %s425_s7  }
 0x219   :  { %421 = dma.done.wait [#allocation4], 1024  }
 0x21a   :  { %422 = vsyncadd [#allocation4], 4294966272 }
 0x21b   :  { %317 = vsyncpa [#allocation4], 1 }

// kernel: tpu_custom_call.1
= control target key start
LH: loop header
LB: loop body
LE: loop exit
PB: predicated region body
PF: predicated region fallthrough
CT: control target
= control target key end

     0   :  { %s496_s0 = inlined_call_operand.vmem [shape: f32[64,32], index: 0, kind: input, shape index: {}]   ;;  %s497_s1 = inlined_call_operand.vmem [shape: f32[32,128], index: 1, kind: input, shape index: {}]   ;;  %s498_s2 = inlined_call_operand.hbm [shape: f32[64,128], index: 2, kind: output, shape index: {}]  }
   0x1   :  { %v43_v0 = vld [vmem:[%s497_s1 + $0x18] sm:$0xff]  ;;  %v42_v1 = vld [vmem:[%s497_s1 + $0x10] sm:$0xff]  ;;  %v41_v2 = vld [vmem:[%s497_s1 + $0x8] sm:$0xff] }
   0x2   :  { %338 = vmatprep.subr.mxu0 %v43_v0  ;;  %358 = vmatprep.subr.mxu1 %v43_v0  ;;  %v40_v3 = vld [vmem:[%s497_s1] sm:$0xff] }
   0x3   :  { %339 = vmatpush3.msra.mxu0 %v43_v0  ;;  %362 = vmatpush3.msra.mxu1 %v43_v0 }
   0x4   :  { %340 = vmatprep.subr.mxu0 %v42_v1  ;;  %359 = vmatprep.subr.mxu1 %v42_v1 }
   0x5   :  { %341 = vmatpush3.msra.mxu0 %v42_v1  ;;  %363 = vmatpush3.msra.mxu1 %v42_v1 }
   0x6   :  { %7 = vsyncpa [#allocation4], 0  ;;  %342 = vmatprep.subr.mxu0 %v41_v2  ;;  %360 = vmatprep.subr.mxu1 %v41_v2  ;;  %v32_v4 = vld [vmem:[%s496_s0] sm:$0xff]  ;;  %vm44_vm0 = vcmask 261120   ;;  %v33_v6 = vld [vmem:[%s496_s0 + $0x8] sm:$0xff]  ;;  %v209_v12 = vlaneseq }
   0x7   :  { %343 = vmatpush3.msra.mxu0 %v41_v2  ;;  %364 = vmatpush3.msra.mxu1 %v41_v2  ;;  %v36_v5 = vld [vmem:[%s496_s0 + $0x20] sm:$0xff]  ;;  %v37_v7 = vld [vmem:[%s496_s0 + $0x28] sm:$0xff]  ;;  %v34_v8 = vld [vmem:[%s496_s0 + $0x10] sm:$0xff] }
   0x8   :  { %344 = vmatprep.subr.mxu0 %v40_v3  ;;  %361 = vmatprep.subr.mxu1 %v40_v3  ;;  %v38_v9 = vld [vmem:[%s496_s0 + $0x30] sm:$0xff]  ;;  %v35_v10 = vld [vmem:[%s496_s0 + $0x18] sm:$0xff]  ;;  %v210_v13 = vand.u32 127, %v209_v12 }
   0x9   :  { %345 = vmatpush3.msra.mxu0 %v40_v3  ;;  %365 = vmatpush3.msra.mxu1 %v40_v3  ;;  %v39_v11 = vld [vmem:[%s496_s0 + $0x38] sm:$0xff]  ;;  %s423_s0 = smov [#allocation3]  }
   0xa   :  { %346 = vmatprep.mubr.msk.f32.mxu0 %vm44_vm0, %v32_v4  ;;  %352 = vmatprep.mubr.msk.f32.mxu1 %vm44_vm0, %v36_v5  ;;  %vm211_vm1 = vcmp.lt.s32.totalorder %v210_v13, 21  ;;  %s307_s4 = sshll.u32 %s423_s0, 4  ;;  %s308_s4 = int_to_ptr.vmem [resolvable:$true] %s307_s4 }
   0xb   :  { %347 = vmatmul.mubr.msk.f32.vlgmr.msra.gmra.mxu0 %vm44_vm0, %v33_v6  ;;  %353 = vmatmul.mubr.msk.f32.vlgmr.msra.gmra.mxu1 %vm44_vm0, %v37_v7  ;;  %s401_s5 = scalar_lea.vmem %s308_s4, 1024  ;;  %p406_p1 = scmp.lt.s32.totalorder %s308_s4, %s308_s4 }
   0xc   :  { %349 = vmatprep.mubr.msk.f32.mxu0 %vm44_vm0, %v34_v8  ;;  %355 = vmatprep.mubr.msk.f32.mxu1 %vm44_vm0, %v38_v9  ;;  %p402_p0 = scmp.ne.s32.totalorder %s308_s4, %s401_s5  ;;  %p407_p2 = scmp.lt.s32.totalorder %s401_s5, %s401_s5 }
   0xe   :  { %p408_p3 = por %p407_p2, %p406_p1 }
   0xf   :  { %350 = vmatmul.mubr.msk.f32.gmra.mxu0 %vm44_vm0, %v35_v10  ;;  %356 = vmatmul.mubr.msk.f32.gmra.mxu1 %vm44_vm0, %v39_v11 }
  0x10   :  { %p409_p4 = pnand %p408_p3, %p402_p0 }
  0xcb   :  { %v348_v14 = vpop.f32.mrf.mxu0  ;;  %v354_v15 = vpop.f32.mrf.mxu1 }
  0xcc   :  { %v202_v16 = vmul.f32 100.0, %v348_v14  ;;  %v206_v17 = vmul.f32 100.0, %v354_v15 }
  0xcd   :  { %v135_v18 = vpop.f32.mrf.mxu0  ;;  %v155_v19 = vpop.f32.mrf.mxu1 }
  0xce   :  { %v201_v20 = vmul.f32 100.0, %v135_v18  ;;  %v219_v21 = vsel %vm211_vm1, %v206_v17, -inf  ;;  %v215_v22 = vsel %vm211_vm1, %v202_v16, -inf  ;;  %v205_v28 = vmul.f32 100.0, %v155_v19 }
  0xcf   :  { %232 = vmax.xlane.f32.xlu1 %v219_v21  ;;  %224 = vmax.xlane.f32.xlu0 %v215_v22  ;;  %v351_v23 = vpop.f32.mrf.mxu0  ;;  %v357_v24 = vpop.f32.mrf.mxu1 }
  0xd0   :  { %v204_v25 = vmul.f32 100.0, %v351_v23  ;;  %v214_v29 = vsel %vm211_vm1, %v201_v20, -inf  ;;  %v208_v32 = vmul.f32 100.0, %v357_v24  ;;  %v218_v35 = vsel %vm211_vm1, %v205_v28, -inf }
  0xd1   :  { %v145_v26 = vpop.f32.mrf.mxu0  ;;  %v165_v27 = vpop.f32.mrf.mxu1 }
  0xd2   :  { %v217_v30 = vsel %vm211_vm1, %v204_v25, -inf  ;;  %v203_v31 = vmul.f32 100.0, %v145_v26  ;;  %v207_v33 = vmul.f32 100.0, %v165_v27  ;;  %v221_v37 = vsel %vm211_vm1, %v208_v32, -inf }
  0xd3   :  { %222 = vmax.xlane.f32.xlu0 %v214_v29  ;;  %228 = vmax.xlane.f32.xlu1 %v217_v30 }
  0xd4   :  { %v216_v34 = vsel %vm211_vm1, %v203_v31, -inf  ;;  %v220_v36 = vsel %vm211_vm1, %v207_v33, -inf }
  0xd7   :  { %230 = vmax.xlane.f32.xlu0 %v218_v35  ;;  %226 = vmax.xlane.f32.xlu1 %v216_v34 }
  0xdb   :  { %234 = vmax.xlane.f32.xlu0 %v220_v36  ;;  %236 = vmax.xlane.f32.xlu1 %v221_v37 }
 0x158   :  { %v233_v38 = vpop.xlane.xlu1 %232  ;;  %v225_v39 = vpop.xlane.xlu0 %224 }
 0x159   :  { %v239_v40 = vsub.f32 %v215_v22, %v225_v39  ;;  %v243_v41 = vsub.f32 %v219_v21, %v233_v38 }
 0x15b   :  { %v248_v42 = vmul.f32 1.442695, %v239_v40  ;;  %v256_v46 = vmul.f32 1.442695, %v243_v41 }
 0x15c   :  { %v223_v43 = vpop.xlane.xlu0 %222  ;;  %v229_v44 = vpop.xlane.xlu1 %228 }
 0x15d   :  { %v238_v45 = vsub.f32 %v214_v29, %v223_v43  ;;  %369 = vpow2.f32 %v248_v42  ;;  %v241_v47 = vsub.f32 %v217_v30, %v229_v44 }
 0x15f   :  { %v246_v48 = vmul.f32 1.442695, %v238_v45  ;;  %v252_v53 = vmul.f32 1.442695, %v241_v47 }
 0x160   :  { %v231_v49 = vpop.xlane.xlu0 %230  ;;  %v227_v50 = vpop.xlane.xlu1 %226 }
 0x161   :  { %371 = vpow2.f32 %v246_v48  ;;  %v242_v51 = vsub.f32 %v218_v35, %v231_v49  ;;  %v240_v52 = vsub.f32 %v216_v34, %v227_v50 }
 0x162   :  { %373 = vpow2.f32 %v256_v46 }
 0x163   :  { %v254_v54 = vmul.f32 1.442695, %v242_v51  ;;  %v250_v57 = vmul.f32 1.442695, %v240_v52 }
 0x164   :  { %v235_v55 = vpop.xlane.xlu0 %234  ;;  %v237_v56 = vpop.xlane.xlu1 %236 }
 0x165   :  { %375 = vpow2.f32 %v254_v54  ;;  %v244_v58 = vsub.f32 %v220_v36, %v235_v55  ;;  %v245_v59 = vsub.f32 %v221_v37, %v237_v56 }
 0x166   :  { %377 = vpow2.f32 %v252_v53 }
 0x167   :  { %v260_v60 = vmul.f32 1.442695, %v245_v59  ;;  %379 = vpow2.f32 %v250_v57  ;;  %v258_v61 = vmul.f32 1.442695, %v244_v58 }
 0x169   :  { %381 = vpow2.f32 %v260_v60 }
 0x16a   :  { %v370_v62 = vpop.eup %369  ;;  %383 = vpow2.f32 %v258_v61 }
 0x16b   :  { %264 = vadd.xlane.f32.xlu1 %v370_v62 }
 0x16e   :  { %v372_v63 = vpop.eup %371 }
 0x16f   :  { %v374_v0 = vpop.eup %373  ;;  %262 = vadd.xlane.f32.xlu0 %v372_v63 }
 0x170   :  { %272 = vadd.xlane.f32.xlu1 %v374_v0 }
 0x172   :  { %v376_v1 = vpop.eup %375 }
 0x173   :  { %v378_v2 = vpop.eup %377  ;;  %270 = vadd.xlane.f32.xlu0 %v376_v1 }
 0x174   :  { %268 = vadd.xlane.f32.xlu1 %v378_v2  ;;  %v380_v3 = vpop.eup %379 }
 0x176   :  { %v382_v4 = vpop.eup %381 }
 0x177   :  { %266 = vadd.xlane.f32.xlu0 %v380_v3  ;;  %v384_v5 = vpop.eup %383 }
 0x178   :  { %276 = vadd.xlane.f32.xlu1 %v382_v4 }
 0x17b   :  { %274 = vadd.xlane.f32.xlu0 %v384_v5 }
 0x1f4   :  { %v265_v6 = vpop.xlane.xlu1 %264 }
 0x1f5   :  { %385 = vrcp.f32 %v265_v6 }
 0x1f8   :  { %v263_v7 = vpop.xlane.xlu0 %262 }
 0x1f9   :  { %387 = vrcp.f32 %v263_v7  ;;  %v273_v8 = vpop.xlane.xlu1 %272 }
 0x1fa   :  { %389 = vrcp.f32 %v273_v8 }
 0x1fc   :  { %v271_v9 = vpop.xlane.xlu0 %270 }
 0x1fd   :  { %391 = vrcp.f32 %v271_v9  ;;  %v269_v10 = vpop.xlane.xlu1 %268 }
 0x1fe   :  { %393 = vrcp.f32 %v269_v10 }
 0x200   :  { %v267_v11 = vpop.xlane.xlu0 %266 }
 0x201   :  { %395 = vrcp.f32 %v267_v11  ;;  %v277_v12 = vpop.xlane.xlu1 %276 }
 0x202   :  { %397 = vrcp.f32 %v277_v12  ;;  %v386_v13 = vpop.eup %385 }
 0x203   :  { %v287_v14 = vmul.f32 %v386_v13, %v370_v62 }
 0x204   :  { %v275_v15 = vpop.xlane.xlu0 %274 }
 0x205   :  { %399 = vrcp.f32 %v275_v15  ;;  %295 = vst [vmem:[#allocation3 + $0x8] sm:$0xff] %v287_v14 }
 0x206   :  { %v388_v16 = vpop.eup %387 }
 0x207   :  { %v390_v17 = vpop.eup %389  ;;  %v286_v18 = vmul.f32 %v388_v16, %v372_v63 }
 0x208   :  { %v291_v19 = vmul.f32 %v390_v17, %v374_v0 }
 0x209   :  { %294 = vst [vmem:[#allocation3] sm:$0xff] %v286_v18 }
 0x20a   :  { %v392_v20 = vpop.eup %391  ;;  %299 = vst [vmem:[#allocation3 + $0x28] sm:$0xff] %v291_v19 }
 0x20b   :  { %v394_v21 = vpop.eup %393  ;;  %v290_v22 = vmul.f32 %v392_v20, %v376_v1 }
 0x20c   :  { %v289_v23 = vmul.f32 %v394_v21, %v378_v2 }
 0x20d   :  { %298 = vst [vmem:[#allocation3 + $0x20] sm:$0xff] %v290_v22 }
 0x20e   :  { %v396_v24 = vpop.eup %395  ;;  %297 = vst [vmem:[#allocation3 + $0x18] sm:$0xff] %v289_v23 }
 0x20f   :  { %v398_v25 = vpop.eup %397  ;;  %v288_v26 = vmul.f32 %v396_v24, %v380_v3 }
 0x210   :  { %v293_v27 = vmul.f32 %v398_v25, %v382_v4 }
 0x211   :  { %296 = vst [vmem:[#allocation3 + $0x10] sm:$0xff] %v288_v26 }
 0x212   :  { %v400_v28 = vpop.eup %399  ;;  %301 = vst [vmem:[#allocation3 + $0x38] sm:$0xff] %v293_v27 }
 0x213   :  { %v292_v29 = vmul.f32 %v400_v28, %v384_v5 }
 0x215   :  { %300 = vst [vmem:[#allocation3 + $0x30] sm:$0xff] %v292_v29 }
 0x216   :  { %412 = shalt.err (!%p409_p4)
}
 0x217   :  { %s424_s6 = smov 128   ;;  %s425_s7 = smov 8  }
 0x218   :  { %313 = dma.vmem_to_hbm [thread:$0]  %s308_s4, 1024, %s498_s2, [#allocation4], %s424_s6, %s424_s6, %s425_s7  }
 0x219   :  { %421 = dma.done.wait [#allocation4], 1024  }
 0x21a   :  { %422 = vsyncadd [#allocation4], 4294966272 }
 0x21b   :  { %317 = vsyncpa [#allocation4], 1 }

</bundles_post_ra>
